<compile_context>
chip_gen: v7x
topology: tpu7x:2x2x1
jax: 0.10.0
libtpu: 0.0.40
codegen_flags: <defaults>
</compile_context>

<pallas_src>
import math
import functools

import jax
import jax.numpy as jnp
from jax.experimental import pallas as pl
from jax.experimental.pallas import tpu as pltpu


_LANES = 128
_SUBLANES = 8
_MAX_BLOCKS_PER_TILE = 512   # 512 * (8*128) f32 = 2 MiB per input tile


def _num_tensorcores() -> int:
    """2 TensorCores per chip on v7x, 1 on v5e/v6e (conservative fallback: 1)."""
    try:
        kind = jax.devices()[0].device_kind.lower()
    except Exception:
        return 1
    # TODO(synk): on v7x confirm via profile that the size-2 "parallel" axis
    # actually lands on both TensorCores; if not, switch to pltpu.CORE_PARALLEL.
    return 2 if "v7" in kind else 1


def _bin_mle_loss_kernel(probs_ref, mles_ref, out_ref, *, g_table, n_f,
                         blocks_per_tile, steps_per_core, total_blocks):
    """Elementwise binomial-NLL-with-MLE loss, vector-accumulated per core.

    bin_loss = lgamma(obs+1) + lgamma(N-obs+1) - lgamma(N+1) + N * BCE(probs, mles)
    with obs = trunc(mles * N) and BCE log terms clamped at -100 (torch BCELoss).
    """
    c = pl.program_id(0)
    i = pl.program_id(1)

    @pl.when(i == 0)
    def _():
        out_ref[...] = jnp.zeros_like(out_ref)

    probs = probs_ref[...].astype(jnp.float32)
    mles = mles_ref[...].astype(jnp.float32)

    # x = mles * N; trunc(x) reproduces torch's (mles * N).int() for x >= 0,
    # and x >= j  <=>  trunc(x) >= j for integer j >= 1.
    # TODO(synk): assumes mles in [0, 1]; the select chain saturates outside it.
    x = mles * n_f

    # Factorial part: monotone cumulative select of absolute table values,
    #   fact = g[obs],  g[j] = lgamma(j+1) + lgamma(N-j+1) - lgamma(N+1), g[0]=0.
    fact = jnp.zeros_like(x)
    for j in range(1, len(g_table)):
        fact = jnp.where(x >= float(j), g_table[j], fact)

    # torch.nn.BCELoss clamps each log term at -100.
    log_p = jnp.maximum(jnp.log(probs), -100.0)
    log_1mp = jnp.maximum(jnp.log(1.0 - probs), -100.0)
    # N * bce = -(x*(log_p - log_1mp) + N*log_1mp)
    loss = fact - (x * (log_p - log_1mp) + n_f * log_1mp)

    # Mask vreg-blocks past the logical end of the input (ragged last tile, or
    # a clamped duplicate tile on the trailing core).  Block-granular: one
    # select per element, iota/compare only on (blocks_per_tile, 1, 1).
    tile_idx = c * steps_per_core + i
    blk = jax.lax.broadcasted_iota(jnp.int32, (blocks_per_tile, 1, 1), 0)
    valid = (tile_idx * blocks_per_tile + blk) < total_blocks
    loss = jnp.where(valid, loss, 0.0)

    # Fold (blocks_per_tile, 8, 128) -> (1, 8, 128) into the resident output.
    out_ref[...] += jnp.sum(loss, axis=0, keepdims=True)


def bin_with_mle_loss(probs, mles, total_trials, reduction="mean"):
    """Pallas implementation of BinWithMLELoss.forward (reduction 'mean'/'sum')."""
    assert probs.shape == mles.shape
    assert reduction in ("mean", "sum")

    n_elems = int(probs.size)
    n_f = float(total_trials)

    # Compile-time table: g[j] = lgamma(j+1) + lgamma(N-j+1) - lgamma(N+1), j=0..N.
    g_table = tuple(
        math.lgamma(j + 1.0) + math.lgamma(total_trials - j + 1.0)
        - math.lgamma(total_trials + 1.0)
        for j in range(total_trials + 1)
    )

    elems_per_block = _SUBLANES * _LANES  # 1024 elements per (8,128) vreg block
    p_flat = probs.reshape(-1)
    m_flat = mles.reshape(-1)
    if n_elems % elems_per_block != 0:
        # TODO(synk): minimal (<1024-elem) pad fallback when numel isn't a
        # multiple of 1024; zero (probs=0, mles=0) padding contributes exactly
        # zero loss (log terms clamped before the x=0 multiply).
        pad = elems_per_block - n_elems % elems_per_block
        p_flat = jnp.pad(p_flat, (0, pad))
        m_flat = jnp.pad(m_flat, (0, pad))

    total_blocks = int(p_flat.size) // elems_per_block
    # Keep caller dtype (bf16 inputs halve HBM traffic); kernel casts to f32.
    p3d = p_flat.reshape(total_blocks, _SUBLANES, _LANES)
    m3d = m_flat.reshape(total_blocks, _SUBLANES, _LANES)

    num_cores = max(1, min(_num_tensorcores(), total_blocks))
    blocks_per_tile = min(_MAX_BLOCKS_PER_TILE, pl.cdiv(total_blocks, num_cores))
    steps_per_core = pl.cdiv(total_blocks, num_cores * blocks_per_tile)
    last_tile = (total_blocks - 1) // blocks_per_tile

    kernel = functools.partial(
        _bin_mle_loss_kernel,
        g_table=g_table, n_f=n_f,
        blocks_per_tile=blocks_per_tile,
        steps_per_core=steps_per_core,
        total_blocks=total_blocks,
    )

    tile = (blocks_per_tile, _SUBLANES, _LANES)

    def in_map(c, i):
        # Clamp so a trailing fully-out-of-range tile re-reads the last valid
        # tile instead of DMA-ing past the array; the kernel mask zeroes it.
        t = c * steps_per_core + i
        return (jnp.minimum(t, last_tile), 0, 0)

    in_bytes = (jnp.dtype(probs.dtype).itemsize + jnp.dtype(mles.dtype).itemsize)
    cost = pl.CostEstimate(
        flops=n_elems * (2 * total_trials + 12),
        transcendentals=2 * n_elems,
        bytes_accessed=n_elems * in_bytes + num_cores * elems_per_block * 4,
    )

    partials = pl.pallas_call(
        kernel,
        out_shape=jax.ShapeDtypeStruct((num_cores, _SUBLANES, _LANES), jnp.float32),
        grid_spec=pltpu.PrefetchScalarGridSpec(
            num_scalar_prefetch=0,
            grid=(num_cores, steps_per_core),
            in_specs=[
                pl.BlockSpec(tile, in_map),
                pl.BlockSpec(tile, in_map),
            ],
            out_specs=pl.BlockSpec((1, _SUBLANES, _LANES), lambda c, i: (c, 0, 0)),
        ),
        compiler_params=pltpu.CompilerParams(
            dimension_semantics=("parallel", "arbitrary"),
        ),
        cost_estimate=cost,
    )(p3d, m3d)

    total = jnp.sum(partials)
    if reduction == "mean":
        return total / float(n_elems)
    return total


def _reference_loss(probs, mles, total_trials):
    """Plain-JAX reference for validation (reduction='mean')."""
    n_f = float(total_trials)
    obs = (mles * n_f).astype(jnp.int32).astype(jnp.float32)
    lfobs = jax.lax.lgamma(obs + 1.0)
    lfobsc = jax.lax.lgamma(n_f - obs + 1.0)
    lfn = jax.lax.lgamma(jnp.float32(n_f + 1.0))
    log_p = jnp.maximum(jnp.log(probs), -100.0)
    log_1mp = jnp.maximum(jnp.log(1.0 - probs), -100.0)
    bce = -(mles * log_p + (1.0 - mles) * log_1mp)
    return jnp.mean(lfobs + lfobsc - lfn + n_f * bce)


if __name__ == "__main__":
    total_trials = 10
    B, C, H, W = 2, 4, 16, 16  # NCHW; loss is elementwise so layout only affects tiling

    key = jax.random.PRNGKey(0)
    kp, km = jax.random.split(key)
    # probs strictly inside (0, 1); mles are observed-count MLEs k/N
    probs = jax.random.uniform(kp, (B, C, H, W), jnp.float32, minval=0.02, maxval=0.98)
    counts = jax.random.randint(km, (B, C, H, W), 0, total_trials + 1)
    mles = counts.astype(jnp.float32) / float(total_trials)

    loss = bin_with_mle_loss(probs, mles, total_trials, reduction="mean")
    loss = jax.block_until_ready(loss)
    ref = _reference_loss(probs, mles, total_trials)
    assert jnp.allclose(loss, ref, atol=1e-3, rtol=1e-4), (loss, ref)

    loss_sum = bin_with_mle_loss(probs, mles, total_trials, reduction="sum")
    jax.block_until_ready(loss_sum)
    ref_sum = ref * float(B * C * H * W)
    assert jnp.allclose(loss_sum, ref_sum, atol=1e-1, rtol=1e-4), (loss_sum, ref_sum)

    # Ragged shape: exercises the tail-mask / minimal-pad fallback path.
    kp2, km2 = jax.random.split(jax.random.PRNGKey(1))
    shape2 = (2, 3, 5, 7)
    probs2 = jax.random.uniform(kp2, shape2, jnp.float32, minval=0.02, maxval=0.98)
    counts2 = jax.random.randint(km2, shape2, 0, total_trials + 1)
    mles2 = counts2.astype(jnp.float32) / float(total_trials)
    loss2 = jax.block_until_ready(bin_with_mle_loss(probs2, mles2, total_trials))
    ref2 = _reference_loss(probs2, mles2, total_trials)
    assert jnp.allclose(loss2, ref2, atol=1e-3, rtol=1e-4), (loss2, ref2)

    print("KERNEL_OK")
</pallas_src>

<mosaic_0001>
module attributes {stable_mosaic.version = 11 : i64} {
  func.func @_bin_mle_loss_kernel(%arg0: i32, %arg1: i32, %arg2: memref<2x8x128xf32, #tpu.memory_space<vmem>>, %arg3: memref<2x8x128xf32, #tpu.memory_space<vmem>>, %arg4: memref<1x8x128xf32, #tpu.memory_space<vmem>>) attributes {dimension_semantics = [#tpu.dimension_semantics<parallel>, #tpu.dimension_semantics<arbitrary>], iteration_bounds = array<i64: 1, 1>, scalar_prefetch = 0 : i64, scratch_operands = 0 : i64, tpu.core_type = #tpu.core_type<tc>, window_params = [{transform_indices = @transform_0, window_bounds = array<i64: 2, 8, 128>}, {transform_indices = @transform_1, window_bounds = array<i64: 2, 8, 128>}, {transform_indices = @transform_2, window_bounds = array<i64: 1, 8, 128>}]} {
    %c0_i32 = arith.constant 0 : i32
    %0 = arith.cmpi eq, %arg1, %c0_i32 : i32
    %1 = arith.extui %0 : i1 to i32
    %c0_i32_0 = arith.constant 0 : i32
    %2 = arith.cmpi ne, %1, %c0_i32_0 : i32
    scf.if %2 {
      %cst_40 = arith.constant 0.000000e+00 : f32
      %79 = vector.broadcast %cst_40 : f32 to vector<1x8x128xf32>
      %c0_41 = arith.constant 0 : index
      %c0_42 = arith.constant 0 : index
      %c0_43 = arith.constant 0 : index
      %80 = vector.load %arg4[%c0_41, %c0_42, %c0_43] : memref<1x8x128xf32, #tpu.memory_space<vmem>>, vector<1x8x128xf32>
      tpu.vector_store %arg4[%c0_41, %c0_42, %c0_43], %79 {strides = array<i32>} : memref<1x8x128xf32, #tpu.memory_space<vmem>>, vector<1x8x128xf32>,
    } else {
    }
    %c0 = arith.constant 0 : index
    %c0_1 = arith.constant 0 : index
    %c0_2 = arith.constant 0 : index
    %3 = vector.load %arg2[%c0, %c0_1, %c0_2] : memref<2x8x128xf32, #tpu.memory_space<vmem>>, vector<2x8x128xf32>
    %c0_3 = arith.constant 0 : index
    %c0_4 = arith.constant 0 : index
    %c0_5 = arith.constant 0 : index
    %4 = vector.load %arg3[%c0_3, %c0_4, %c0_5] : memref<2x8x128xf32, #tpu.memory_space<vmem>>, vector<2x8x128xf32>
    %cst = arith.constant 1.000000e+01 : f32
    %5 = vector.broadcast %cst : f32 to vector<2x8x128xf32>
    %6 = arith.mulf %4, %5 : vector<2x8x128xf32>
    %cst_6 = arith.constant 0.000000e+00 : f32
    %7 = vector.broadcast %cst_6 : f32 to vector<2x8x128xf32>
    %cst_7 = arith.constant 1.000000e+00 : f32
    %8 = vector.broadcast %cst_7 : f32 to vector<2x8x128xf32>
    %9 = arith.cmpf oge, %6, %8 : vector<2x8x128xf32>
    %cst_8 = arith.constant -2.30258512 : f32
    %10 = vector.broadcast %cst_8 : f32 to vector<2x8x128xf32>
    %11 = arith.select %9, %10, %7 : vector<2x8x128xi1>, vector<2x8x128xf32>
    %cst_9 = arith.constant 2.000000e+00 : f32
    %12 = vector.broadcast %cst_9 : f32 to vector<2x8x128xf32>
    %13 = arith.cmpf oge, %6, %12 : vector<2x8x128xf32>
    %cst_10 = arith.constant -3.80666256 : f32
    %14 = vector.broadcast %cst_10 : f32 to vector<2x8x128xf32>
    %15 = arith.select %13, %14, %11 : vector<2x8x128xi1>, vector<2x8x128xf32>
    %cst_11 = arith.constant 3.000000e+00 : f32
    %16 = vector.broadcast %cst_11 : f32 to vector<2x8x128xf32>
    %17 = arith.cmpf oge, %6, %16 : vector<2x8x128xf32>
    %cst_12 = arith.constant -4.7874918 : f32
    %18 = vector.broadcast %cst_12 : f32 to vector<2x8x128xf32>
    %19 = arith.select %17, %18, %15 : vector<2x8x128xi1>, vector<2x8x128xf32>
    %cst_13 = arith.constant 4.000000e+00 : f32
    %20 = vector.broadcast %cst_13 : f32 to vector<2x8x128xf32>
    %21 = arith.cmpf oge, %6, %20 : vector<2x8x128xf32>
    %cst_14 = arith.constant -5.34710741 : f32
    %22 = vector.broadcast %cst_14 : f32 to vector<2x8x128xf32>
    %23 = arith.select %21, %22, %19 : vector<2x8x128xi1>, vector<2x8x128xf32>
    %cst_15 = arith.constant 5.000000e+00 : f32
    %24 = vector.broadcast %cst_15 : f32 to vector<2x8x128xf32>
    %25 = arith.cmpf oge, %6, %24 : vector<2x8x128xf32>
    %cst_16 = arith.constant -5.52942896 : f32
    %26 = vector.broadcast %cst_16 : f32 to vector<2x8x128xf32>
    %27 = arith.select %25, %26, %23 : vector<2x8x128xi1>, vector<2x8x128xf32>
    %cst_17 = arith.constant 6.000000e+00 : f32
    %28 = vector.broadcast %cst_17 : f32 to vector<2x8x128xf32>
    %29 = arith.cmpf oge, %6, %28 : vector<2x8x128xf32>
    %cst_18 = arith.constant -5.34710741 : f32
    %30 = vector.broadcast %cst_18 : f32 to vector<2x8x128xf32>
    %31 = arith.select %29, %30, %27 : vector<2x8x128xi1>, vector<2x8x128xf32>
    %cst_19 = arith.constant 7.000000e+00 : f32
    %32 = vector.broadcast %cst_19 : f32 to vector<2x8x128xf32>
    %33 = arith.cmpf oge, %6, %32 : vector<2x8x128xf32>
    %cst_20 = arith.constant -4.7874918 : f32
    %34 = vector.broadcast %cst_20 : f32 to vector<2x8x128xf32>
    %35 = arith.select %33, %34, %31 : vector<2x8x128xi1>, vector<2x8x128xf32>
    %cst_21 = arith.constant 8.000000e+00 : f32
    %36 = vector.broadcast %cst_21 : f32 to vector<2x8x128xf32>
    %37 = arith.cmpf oge, %6, %36 : vector<2x8x128xf32>
    %cst_22 = arith.constant -3.80666256 : f32
    %38 = vector.broadcast %cst_22 : f32 to vector<2x8x128xf32>
    %39 = arith.select %37, %38, %35 : vector<2x8x128xi1>, vector<2x8x128xf32>
    %cst_23 = arith.constant 9.000000e+00 : f32
    %40 = vector.broadcast %cst_23 : f32 to vector<2x8x128xf32>
    %41 = arith.cmpf oge, %6, %40 : vector<2x8x128xf32>
    %cst_24 = arith.constant -2.30258512 : f32
    %42 = vector.broadcast %cst_24 : f32 to vector<2x8x128xf32>
    %43 = arith.select %41, %42, %39 : vector<2x8x128xi1>, vector<2x8x128xf32>
    %cst_25 = arith.constant 1.000000e+01 : f32
    %44 = vector.broadcast %cst_25 : f32 to vector<2x8x128xf32>
    %45 = arith.cmpf oge, %6, %44 : vector<2x8x128xf32>
    %cst_26 = arith.constant 0.000000e+00 : f32
    %46 = vector.broadcast %cst_26 : f32 to vector<2x8x128xf32>
    %47 = arith.select %45, %46, %43 : vector<2x8x128xi1>, vector<2x8x128xf32>
    %48 = math.log %3 : vector<2x8x128xf32>
    %cst_27 = arith.constant -1.000000e+02 : f32
    %49 = vector.broadcast %cst_27 : f32 to vector<2x8x128xf32>
    %50 = arith.maximumf %48, %49 : vector<2x8x128xf32>
    %cst_28 = arith.constant 1.000000e+00 : f32
    %51 = vector.broadcast %cst_28 : f32 to vector<2x8x128xf32>
    %52 = arith.subf %51, %3 : vector<2x8x128xf32>
    %53 = math.log %52 : vector<2x8x128xf32>
    %cst_29 = arith.constant -1.000000e+02 : f32
    %54 = vector.broadcast %cst_29 : f32 to vector<2x8x128xf32>
    %55 = arith.maximumf %53, %54 : vector<2x8x128xf32>
    %56 = arith.subf %50, %55 : vector<2x8x128xf32>
    %57 = arith.mulf %6, %56 : vector<2x8x128xf32>
    %cst_30 = arith.constant 1.000000e+01 : f32
    %58 = vector.broadcast %cst_30 : f32 to vector<2x8x128xf32>
    %59 = arith.mulf %58, %55 : vector<2x8x128xf32>
    %60 = arith.addf %57, %59 : vector<2x8x128xf32>
    %61 = arith.subf %47, %60 : vector<2x8x128xf32>
    %c1_i32 = arith.constant 1 : i32
    %62 = arith.muli %arg0, %c1_i32 : i32
    %63 = arith.addi %62, %arg1 : i32
    %64 = tpu.iota {dimensions = array<i32: 0>} : vector<2x1x1xi32>
    %c2_i32 = arith.constant 2 : i32
    %65 = arith.muli %63, %c2_i32 : i32
    %66 = vector.broadcast %65 : i32 to vector<2x1x1xi32>
    %67 = arith.addi %66, %64 : vector<2x1x1xi32>
    %c2_i32_31 = arith.constant 2 : i32
    %68 = vector.broadcast %c2_i32_31 : i32 to vector<2x1x1xi32>
    %69 = arith.cmpi slt, %67, %68 : vector<2x1x1xi32>
    %cst_32 = arith.constant 0.000000e+00 : f32
    %70 = vector.shape_cast %69 : vector<2x1x1xi1> to vector<2x1x1xi1>
    %71 = vector.broadcast %70 : vector<2x1x1xi1> to vector<2x8x128xi1>
    %72 = vector.broadcast %cst_32 : f32 to vector<2x8x128xf32>
    %73 = arith.select %71, %61, %72 : vector<2x8x128xi1>, vector<2x8x128xf32>
    %c0_33 = arith.constant 0 : index
    %c0_34 = arith.constant 0 : index
    %c0_35 = arith.constant 0 : index
    %74 = vector.load %arg4[%c0_33, %c0_34, %c0_35] : memref<1x8x128xf32, #tpu.memory_space<vmem>>, vector<1x8x128xf32>
    %cst_36 = arith.constant dense<0.000000e+00> : vector<8x128xf32>
    %75 = vector.multi_reduction <add>, %73, %cst_36 [0] : vector<2x8x128xf32> to vector<8x128xf32>
    %76 = vector.shape_cast %75 : vector<8x128xf32> to vector<1x8x128xf32>
    %77 = arith.addf %74, %76 : vector<1x8x128xf32>
    %c0_37 = arith.constant 0 : index
    %c0_38 = arith.constant 0 : index
    %c0_39 = arith.constant 0 : index
    %78 = vector.load %arg4[%c0_37, %c0_38, %c0_39] : memref<1x8x128xf32, #tpu.memory_space<vmem>>, vector<1x8x128xf32>
    tpu.vector_store %arg4[%c0_37, %c0_38, %c0_39], %77 {strides = array<i32>} : memref<1x8x128xf32, #tpu.memory_space<vmem>>, vector<1x8x128xf32>,
    return
  }
  func.func @transform_0(%arg0: i32, %arg1: i32) -> (i32, i32, i32) {
    %c1_i32 = arith.constant 1 : i32
    %0 = arith.muli %arg0, %c1_i32 : i32
    %1 = arith.addi %0, %arg1 : i32
    %c0_i32 = arith.constant 0 : i32
    %2 = arith.minsi %1, %c0_i32 : i32
    %c0_i32_0 = arith.constant 0 : i32
    %c0_i32_1 = arith.constant 0 : i32
    %c0_i32_2 = arith.constant 0 : i32
    return %2, %c0_i32_0, %c0_i32_1 : i32, i32, i32
  }
  func.func @transform_1(%arg0: i32, %arg1: i32) -> (i32, i32, i32) {
    %c1_i32 = arith.constant 1 : i32
    %0 = arith.muli %arg0, %c1_i32 : i32
    %1 = arith.addi %0, %arg1 : i32
    %c0_i32 = arith.constant 0 : i32
    %2 = arith.minsi %1, %c0_i32 : i32
    %c0_i32_0 = arith.constant 0 : i32
    %c0_i32_1 = arith.constant 0 : i32
    %c0_i32_2 = arith.constant 0 : i32
    return %2, %c0_i32_0, %c0_i32_1 : i32, i32, i32
  }
  func.func @transform_2(%arg0: i32, %arg1: i32) -> (i32, i32, i32) {
    %c0_i32 = arith.constant 0 : i32
    %c0_i32_0 = arith.constant 0 : i32
    %c0_i32_1 = arith.constant 0 : i32
    return %arg0, %c0_i32, %c0_i32_0 : i32, i32, i32
  }
}

</mosaic_0001>

<bundles_post_ra>
// kernel: tpu_custom_call.1
= control target key start
LH: loop header
LB: loop body
LE: loop exit
PB: predicated region body
PF: predicated region fallthrough
CT: control target
= control target key end

     0   :  { %7 = vsyncpa [#allocation3], 0  ;;  %s340_s0 = inlined_call_operand.hbm [shape: f32[2,8,128], index: 0, kind: input, shape index: {}]   ;;  %s341_s1 = inlined_call_operand.hbm [shape: f32[2,8,128], index: 1, kind: input, shape index: {}]   ;;  %s342_s2 = inlined_call_operand.hbm [shape: f32[1,8,128], index: 2, kind: output, shape index: {}]  }
   0x1   :  { %8 = vsyncpa [#allocation6], 0 }
   0x2   :  { %9 = vsyncpa [#allocation4], 0  ;;  %s257_s9 = smov [#allocation2]   ;;  %s185_s13 = scalar_lea.hbm %s340_s0, 256 }
   0x3   :  { %s21_s10 = sshll.u32 %s257_s9, 4  ;;  %p186_p0 = scmp.ne.s32.totalorder %s340_s0, %s185_s13  ;;  %s22_s10 = int_to_ptr.vmem [resolvable:$true] %s21_s10 }
   0x4   :  { %p189_p1 = scmp.lt.u32.totalorder %s185_s13, %s340_s0 }
   0x6   :  { %p191_p2 = pnand %p189_p1, %p186_p0 }
   0x8   :  { %194 = shalt.err (!%p191_p2)
}
   0x9   :  { %s195_s18 = scalar_lea.vmem %s22_s10, 256  ;;  %p200_p4 = scmp.lt.s32.totalorder %s22_s10, %s22_s10 }
   0xa   :  { %p196_p3 = scmp.ne.s32.totalorder %s22_s10, %s195_s18  ;;  %p201_p5 = scmp.lt.s32.totalorder %s195_s18, %s195_s18 }
   0xc   :  { %p202_p6 = por %p201_p5, %p200_p4 }
   0xe   :  { %p203_p7 = pnand %p202_p6, %p196_p3 }
  0x10   :  { %206 = shalt.err (!%p203_p7)
}
  0x11   :  { %s258_s19 = smov 128   ;;  %s259_s20 = smov 8  }
  0x12   :  { %27 = dma.hbm_to_vmem [thread:$0]  %s340_s0, 256, %s22_s10, [#allocation3], %s258_s19, %s258_s19, %s259_s20  }
  0x13   :  { %s260_s23 = smov [#allocation5]   ;;  %s207_s27 = scalar_lea.hbm %s341_s1, 256 }
  0x14   :  { %s39_s24 = sshll.u32 %s260_s23, 4  ;;  %p208_p8 = scmp.ne.s32.totalorder %s341_s1, %s207_s27  ;;  %s40_s24 = int_to_ptr.vmem [resolvable:$true] %s39_s24 }
  0x15   :  { %p211_p9 = scmp.lt.u32.totalorder %s207_s27, %s341_s1 }
  0x17   :  { %p213_p10 = pnand %p211_p9, %p208_p8 }
  0x19   :  { %216 = shalt.err (!%p213_p10)
}
  0x1a   :  { %s217_s4 = scalar_lea.vmem %s40_s24, 256  ;;  %p222_p12 = scmp.lt.s32.totalorder %s40_s24, %s40_s24 }
  0x1b   :  { %p218_p11 = scmp.ne.s32.totalorder %s40_s24, %s217_s4  ;;  %p223_p13 = scmp.lt.s32.totalorder %s217_s4, %s217_s4 }
  0x1d   :  { %p224_p0 = por %p223_p13, %p222_p12 }
  0x1f   :  { %p225_p1 = pnand %p224_p0, %p218_p11 }
  0x21   :  { %228 = shalt.err (!%p225_p1)
}
  0x22   :  { %45 = dma.hbm_to_vmem [thread:$0]  %s341_s1, 256, %s40_s24, [#allocation6], %s258_s19, %s258_s19, %s259_s20  }
  0x23   :  { %251 = dma.done.wait [#allocation3], 256  }
  0x24   :  { %252 = vsyncadd [#allocation3], 4294967040 }
  0x25   :  { %253 = dma.done.wait [#allocation6], 256  }
  0x26   :  { %254 = vsyncadd [#allocation6], 4294967040  ;;  %v67_v0 = vld [vmem:[#allocation5] sm:$0xff]  ;;  %v68_v1 = vld [vmem:[#allocation5 + $0x8] sm:$0xff]  ;;  %v261_v4 = vmov 0.0   ;;  %s262_s1 = smov [#allocation7]  }
  0x27   :  { %v302_v2 = vmul.f32 10.0, %v67_v0  ;;  %v304_v3 = vmul.f32 10.0, %v68_v1  ;;  %v65_v7 = vld [vmem:[#allocation2] sm:$0xff]  ;;  %v66_v9 = vld [vmem:[#allocation2 + $0x8] sm:$0xff]  ;;  %s157_s6 = sshll.u32 %s262_s1, 4  ;;  %s158_s6 = int_to_ptr.vmem [resolvable:$true] %s157_s6 }
  0x28   :  { %177 = vlog2.f32 %v65_v7  ;;  %v117_v11 = vsub.f32 1.0, %v65_v7  ;;  %v118_v13 = vsub.f32 1.0, %v66_v9  ;;  %s229_s7 = scalar_lea.vmem %s158_s6, 128  ;;  %p234_p3 = scmp.lt.s32.totalorder %s158_s6, %s158_s6 }
  0x29   :  { %vm71_vm0 = vcmp.ge.f32.partialorder %v302_v2, 1.0  ;;  %vm72_vm1 = vcmp.ge.f32.partialorder %v304_v3, 1.0  ;;  %vm75_vm2 = vcmp.ge.f32.partialorder %v302_v2, 2.0  ;;  %vm76_vm3 = vcmp.ge.f32.partialorder %v304_v3, 2.0  ;;  %p230_p2 = scmp.ne.s32.totalorder %s158_s6, %s229_s7  ;;  %p235_p4 = scmp.lt.s32.totalorder %s229_s7, %s229_s7 }
  0x2a   :  { %v73_v5 = vsel %vm71_vm0, -2.3025851, %v261_v4  ;;  %v74_v6 = vsel %vm72_vm1, -2.3025851, %v261_v4  ;;  %vm79_vm4 = vcmp.ge.f32.partialorder %v302_v2, 3.0  ;;  %vm80_vm5 = vcmp.ge.f32.partialorder %v304_v3, 3.0 }
  0x2b   :  { %v77_v8 = vsel %vm75_vm2, -3.8066626, %v73_v5  ;;  %v78_v10 = vsel %vm76_vm3, -3.8066626, %v74_v6  ;;  %179 = vlog2.f32 %v66_v9  ;;  %vm83_vm6 = vcmp.ge.f32.partialorder %v302_v2, 4.0  ;;  %p236_p5 = por %p235_p4, %p234_p3 }
  0x2c   :  { %v81_v12 = vsel %vm79_vm4, -4.787492, %v77_v8  ;;  %v82_v14 = vsel %vm80_vm5, -4.787492, %v78_v10  ;;  %vm84_vm7 = vcmp.ge.f32.partialorder %v304_v3, 4.0  ;;  %vm87_vm8 = vcmp.ge.f32.partialorder %v302_v2, 5.0 }
  0x2d   :  { %v85_v15 = vsel %vm83_vm6, -5.3471074, %v81_v12  ;;  %181 = vlog2.f32 %v117_v11  ;;  %v86_v16 = vsel %vm84_vm7, -5.3471074, %v82_v14  ;;  %vm88_vm9 = vcmp.ge.f32.partialorder %v304_v3, 5.0  ;;  %p237_p6 = pnand %p236_p5, %p230_p2 }
  0x2e   :  { %183 = vlog2.f32 %v118_v13  ;;  %v89_v17 = vsel %vm87_vm8, -5.529429, %v85_v15  ;;  %vm91_vm10 = vcmp.ge.f32.partialorder %v302_v2, 6.0  ;;  %v90_v19 = vsel %vm88_vm9, -5.529429, %v86_v16 }
  0x2f   :  { %vm92_vm11 = vcmp.ge.f32.partialorder %v304_v3, 6.0  ;;  %v93_v21 = vsel %vm91_vm10, -5.3471074, %v89_v17  ;;  %vm95_vm12 = vcmp.ge.f32.partialorder %v302_v2, 7.0  ;;  %vm96_vm13 = vcmp.ge.f32.partialorder %v304_v3, 7.0 }
  0x30   :  { %v94_v22 = vsel %vm92_vm11, -5.3471074, %v90_v19  ;;  %v97_v25 = vsel %vm95_vm12, -4.787492, %v93_v21  ;;  %vm99_vm14 = vcmp.ge.f32.partialorder %v302_v2, 8.0  ;;  %vm100_vm15 = vcmp.ge.f32.partialorder %v304_v3, 8.0 }
  0x31   :  { %v98_v27 = vsel %vm96_vm13, -4.787492, %v94_v22  ;;  %v101_v31 = vsel %vm99_vm14, -3.8066626, %v97_v25  ;;  %vm103_vm0 = vcmp.ge.f32.partialorder %v302_v2, 9.0  ;;  %vm104_vm1 = vcmp.ge.f32.partialorder %v304_v3, 9.0 }
  0x32   :  { %v178_v18 = vpop.eup %177  ;;  %v102_v34 = vsel %vm100_vm15, -3.8066626, %v98_v27  ;;  %v105_v37 = vsel %vm103_vm0, -2.3025851, %v101_v31  ;;  %vm107_vm2 = vcmp.ge.f32.partialorder %v302_v2, 10.0  ;;  %vm108_vm3 = vcmp.ge.f32.partialorder %v304_v3, 10.0 }
  0x33   :  { %v112_v23 = vmul.f32 0.6931472, %v178_v18  ;;  %v106_v40 = vsel %vm104_vm1, -2.3025851, %v102_v34  ;;  %v109_v44 = vsel %vm107_vm2, 0.0, %v105_v37 }
  0x34   :  { %v110_v46 = vsel %vm108_vm3, 0.0, %v106_v40 }
  0x35   :  { %v180_v20 = vpop.eup %179  ;;  %v115_v29 = vmax.f32 %v112_v23, -100.0 }
  0x36   :  { %v114_v24 = vmul.f32 0.6931472, %v180_v20 }
  0x37   :  { %v182_v26 = vpop.eup %181 }
  0x38   :  { %v184_v28 = vpop.eup %183  ;;  %v120_v30 = vmul.f32 0.6931472, %v182_v26  ;;  %v116_v32 = vmax.f32 %v114_v24, -100.0 }
  0x39   :  { %v122_v33 = vmul.f32 0.6931472, %v184_v28 }
  0x3a   :  { %v123_v35 = vmax.f32 %v120_v30, -100.0 }
  0x3b   :  { %v124_v36 = vmax.f32 %v122_v33, -100.0 }
  0x3c   :  { %v125_v38 = vsub.f32 %v115_v29, %v123_v35  ;;  %v129_v39 = vmul.f32 10.0, %v123_v35 }
  0x3d   :  { %v126_v41 = vsub.f32 %v116_v32, %v124_v36  ;;  %v130_v42 = vmul.f32 10.0, %v124_v36 }
  0x3e   :  { %v127_v43 = vmul.f32 %v125_v38, %v302_v2 }
  0x3f   :  { %v128_v45 = vmul.f32 %v126_v41, %v304_v3 }
  0x40   :  { %v131_v47 = vadd.f32 %v129_v39, %v127_v43 }
  0x41   :  { %v132_v48 = vadd.f32 %v130_v42, %v128_v45 }
  0x42   :  { %v133_v49 = vsub.f32 %v109_v44, %v131_v47 }
  0x43   :  { %v134_v50 = vsub.f32 %v110_v46, %v132_v48 }
  0x45   :  { %v148_v51 = vadd.f32 %v134_v50, %v133_v49 }
  0x47   :  { %150 = vst [vmem:[#allocation7] sm:$0xff] %v148_v51 }
  0x48   :  { %240 = shalt.err (!%p237_p6)
}
  0x49   :  { %s241_s10 = scalar_lea.hbm %s342_s2, 128 }
  0x4a   :  { %p242_p7 = scmp.ne.s32.totalorder %s342_s2, %s241_s10  ;;  %p245_p8 = scmp.lt.u32.totalorder %s241_s10, %s342_s2 }
  0x4c   :  { %p247_p9 = pnand %p245_p8, %p242_p7 }
  0x4e   :  { %250 = shalt.err (!%p247_p9)
}
  0x4f   :  { %160 = dma.vmem_to_hbm [thread:$0]  %s158_s6, 128, %s342_s2, [#allocation4]  }
  0x50   :  { %255 = dma.done.wait [#allocation4], 128  }
  0x51   :  { %256 = vsyncadd [#allocation4], 4294967168 }
  0x52   :  { %164 = vsyncpa [#allocation3], 1 }
  0x53   :  { %165 = vsyncpa [#allocation6], 1 }
  0x54   :  { %166 = vsyncpa [#allocation4], 1 }

</bundles_post_ra>
